<compile_context>
chip_gen: v5e
topology: v5e:2x2
jax: 0.10.0
libtpu: 0.0.40
codegen_flags: <defaults>
</compile_context>

<pallas_src>
import functools
import math

import jax
import jax.numpy as jnp
from jax.experimental import pallas as pl
from jax.experimental.pallas import tpu as pltpu

_INV_LN2 = 1.0 / math.log(2.0)


def _kd_gs_kernel(out_ref, tg_ref, loss_ref, w_ref, *, gs):
    # out_ref : (C, TP) student logits tile
    # tg_ref  : (C, TP) teacher logits tile
    # loss_ref: (1, TP) per-pixel weighted loss  (w * sum_c p_t * p_o)
    # w_ref   : (1, TP) per-pixel weight         (entropy * gs + 1)
    x = out_ref[...].astype(jnp.float32)
    t = tg_ref[...].astype(jnp.float32)

    # student softmax pieces (never materialize normalized probs)
    xm = jnp.max(x, axis=0, keepdims=True)
    xe = jnp.exp(x - xm)                                       # (C, TP)
    inv_xs = pl.reciprocal(jnp.sum(xe, axis=0, keepdims=True), approx=False)

    # teacher softmax (needed explicitly because of log(p + 1e-8))
    tm = jnp.max(t, axis=0, keepdims=True)
    te = jnp.exp(t - tm)                                       # (C, TP)
    inv_ts = pl.reciprocal(jnp.sum(te, axis=0, keepdims=True), approx=False)
    p_t = te * inv_ts                                          # (C, TP)

    # entropy (bits) -> weights
    ent = -jnp.sum(p_t * jnp.log(p_t + 1e-8), axis=0, keepdims=True) * _INV_LN2
    w = ent * gs + 1.0                                         # (1, TP)

    # sum_c p_t * p_o  ==  (sum_c p_t * e_x) / sum_c e_x
    sp = jnp.sum(p_t * xe, axis=0, keepdims=True) * inv_xs     # (1, TP)

    loss_ref[...] = w * sp
    w_ref[...] = w


def _choose_tp(P, c_total):
    """Lane-dense pixel tile from a ~4 MiB double-buffered f32 input budget."""
    budget = 4 * 1024 * 1024
    tp = budget // (4 * c_total * 2)          # bytes/elem * 2 buffers
    tp = min(tp, 8192)
    p128 = ((P + 127) // 128) * 128
    tp = min(tp, p128)
    tp = max(128, (tp // 128) * 128)
    return tp


def kd_ce_loss_with_gradient_scaling(outputs, targets, targets_new=None,
                                     temp=1, gs=1.0, norm=False):
    """outputs, targets: (B, C, H, W) logits; targets_new: optional (B, H, W)."""
    B, C, H, W = outputs.shape
    assert targets.shape == outputs.shape, "shapes of outputs and targets must agree"
    P = H * W

    # free, contiguous reshape — no HBM transpose
    x = outputs.reshape(B, C, P)
    t = targets.reshape(B, C, P)

    TP = _choose_tp(P, 2 * C)
    P_pad = pl.cdiv(P, TP) * TP
    if P_pad != P:
        pad = P_pad - P
        x = jnp.pad(x, ((0, 0), (0, 0), (0, pad)))
        t = jnp.pad(t, ((0, 0), (0, 0), (0, pad)))

    grid = (B, P_pad // TP)
    loss_px, w_px = pl.pallas_call(
        functools.partial(_kd_gs_kernel, gs=float(gs)),
        out_shape=(jax.ShapeDtypeStruct((B, 1, P_pad), jnp.float32),
                   jax.ShapeDtypeStruct((B, 1, P_pad), jnp.float32)),
        grid_spec=pltpu.PrefetchScalarGridSpec(
            num_scalar_prefetch=0,
            grid=grid,
            in_specs=[
                pl.BlockSpec((None, C, TP), lambda b, i: (b, 0, i)),
                pl.BlockSpec((None, C, TP), lambda b, i: (b, 0, i)),
            ],
            out_specs=[
                pl.BlockSpec((None, 1, TP), lambda b, i: (b, 0, i)),
                pl.BlockSpec((None, 1, TP), lambda b, i: (b, 0, i)),
            ],
        ),
        compiler_params=pltpu.CompilerParams(
            dimension_semantics=("parallel", "parallel")),
    )(x, t)

    # drop padded pixels before the reduction
    loss_px = loss_px[:, :, :P]
    w_px = w_px[:, :, :P]

    denom_corr = 0.0
    if targets_new is not None:
        mask0 = ((targets_new == 255) | (targets_new == 0)).astype(jnp.float32)  # (B,H,W)
        denom_corr = float(mask0.size) - jnp.sum(mask0)
        mask = mask0.reshape(B, 1, P)
        loss_px = mask * loss_px         # == w*sum(mask*p_t * p_o) since mask in {0,1}
        w_px = mask * w_px

    if norm:
        denom = jnp.sum(w_px)
    else:
        denom = float(B * P) - denom_corr

    total = jnp.sum(loss_px) / (denom + 1e-8)
    return (temp ** 2) * total


def _reference(outputs, targets, targets_new=None, temp=1, gs=1.0, norm=False):
    """Pure-JAX mirror of the PyTorch forward."""
    t_sm = jax.nn.softmax(targets, axis=1)
    o_sm = jax.nn.softmax(outputs, axis=1)
    denom_corr = 0.0
    entropy = -jnp.sum(t_sm * jnp.log(t_sm + 1e-8), axis=1, keepdims=True) / jnp.log(2.0)
    weights = entropy * gs + 1.0
    if targets_new is not None:
        mask = jnp.where((targets_new == 255) | (targets_new == 0), 1.0, 0.0)
        denom_corr = float(mask.size) - jnp.sum(mask)
        mask = mask.reshape(mask.shape[0], 1, *mask.shape[1:])
        weights = mask * weights
        t_sm = mask * t_sm
    loss = weights * jnp.sum(t_sm * o_sm, axis=1, keepdims=True)
    if norm:
        denom = jnp.sum(weights)
    else:
        denom = float(loss[:, 0, ...].size) - denom_corr
    return (temp ** 2) * jnp.sum(loss) / (denom + 1e-8)


if __name__ == "__main__":
    key = jax.random.PRNGKey(0)
    k1, k2, k3, k4 = jax.random.split(key, 4)
    B, C, Hs, Ws = 2, 4, 16, 16

    outputs = jax.random.normal(k1, (B, C, Hs, Ws), dtype=jnp.float32) * 2.0
    targets = jax.random.normal(k2, (B, C, Hs, Ws), dtype=jnp.float32) * 2.0
    tn = jax.random.randint(k3, (B, Hs, Ws), 0, 4)
    tn = jnp.where(jax.random.uniform(k4, (B, Hs, Ws)) < 0.2, 255, tn)

    cases = [
        dict(targets_new=None, temp=1, gs=1.0, norm=False),
        dict(targets_new=tn,   temp=1, gs=2.0, norm=False),
        dict(targets_new=tn,   temp=2, gs=1.0, norm=True),
    ]
    for cfg in cases:
        got = kd_ce_loss_with_gradient_scaling(outputs, targets, **cfg)
        got = jax.block_until_ready(got)
        ref = _reference(outputs, targets, **cfg)
        assert jnp.allclose(got, ref, atol=1e-5, rtol=1e-5), (cfg, got, ref)

    print("KERNEL_OK")
</pallas_src>

<mosaic_0001>
module attributes {stable_mosaic.version = 11 : i64} {
  func.func @_kd_gs_kernel(%arg0: i32, %arg1: i32, %arg2: memref<1x4x256xf32, #tpu.memory_space<vmem>>, %arg3: memref<1x4x256xf32, #tpu.memory_space<vmem>>, %arg4: memref<1x1x256xf32, #tpu.memory_space<vmem>>, %arg5: memref<1x1x256xf32, #tpu.memory_space<vmem>>) attributes {dimension_semantics = [#tpu.dimension_semantics<parallel>, #tpu.dimension_semantics<parallel>], iteration_bounds = array<i64: 2, 1>, scalar_prefetch = 0 : i64, scratch_operands = 0 : i64, tpu.core_type = #tpu.core_type<tc>, window_params = [{transform_indices = @transform_0, window_bounds = array<i64: 1, 4, 256>}, {transform_indices = @transform_1, window_bounds = array<i64: 1, 4, 256>}, {transform_indices = @transform_2, window_bounds = array<i64: 1, 1, 256>}, {transform_indices = @transform_3, window_bounds = array<i64: 1, 1, 256>}]} {
    %c0 = arith.constant 0 : index
    %c0_0 = arith.constant 0 : index
    %c0_1 = arith.constant 0 : index
    %0 = vector.load %arg2[%c0, %c0_0, %c0_1] : memref<1x4x256xf32, #tpu.memory_space<vmem>>, vector<1x4x256xf32>
    %1 = vector.shape_cast %0 : vector<1x4x256xf32> to vector<4x256xf32>
    %c0_2 = arith.constant 0 : index
    %c0_3 = arith.constant 0 : index
    %c0_4 = arith.constant 0 : index
    %2 = vector.load %arg3[%c0_2, %c0_3, %c0_4] : memref<1x4x256xf32, #tpu.memory_space<vmem>>, vector<1x4x256xf32>
    %3 = vector.shape_cast %2 : vector<1x4x256xf32> to vector<4x256xf32>
    %cst = arith.constant dense<0xFF800000> : vector<256xf32>
    %4 = vector.multi_reduction <maximumf>, %1, %cst [0] : vector<4x256xf32> to vector<256xf32>
    %5 = vector.shape_cast %4 : vector<256xf32> to vector<1x256xf32>
    %6 = vector.broadcast %5 : vector<1x256xf32> to vector<4x256xf32>
    %7 = arith.subf %1, %6 : vector<4x256xf32>
    %8 = math.exp %7 : vector<4x256xf32>
    %cst_5 = arith.constant dense<0.000000e+00> : vector<256xf32>
    %9 = vector.multi_reduction <add>, %8, %cst_5 [0] : vector<4x256xf32> to vector<256xf32>
    %10 = vector.shape_cast %9 : vector<256xf32> to vector<1x256xf32>
    %11 = tpu.reciprocal %10 : vector<1x256xf32> -> vector<1x256xf32>
    %cst_6 = arith.constant dense<0xFF800000> : vector<256xf32>
    %12 = vector.multi_reduction <maximumf>, %3, %cst_6 [0] : vector<4x256xf32> to vector<256xf32>
    %13 = vector.shape_cast %12 : vector<256xf32> to vector<1x256xf32>
    %14 = vector.broadcast %13 : vector<1x256xf32> to vector<4x256xf32>
    %15 = arith.subf %3, %14 : vector<4x256xf32>
    %16 = math.exp %15 : vector<4x256xf32>
    %cst_7 = arith.constant dense<0.000000e+00> : vector<256xf32>
    %17 = vector.multi_reduction <add>, %16, %cst_7 [0] : vector<4x256xf32> to vector<256xf32>
    %18 = vector.shape_cast %17 : vector<256xf32> to vector<1x256xf32>
    %19 = tpu.reciprocal %18 : vector<1x256xf32> -> vector<1x256xf32>
    %20 = vector.broadcast %19 : vector<1x256xf32> to vector<4x256xf32>
    %21 = arith.mulf %16, %20 : vector<4x256xf32>
    %cst_8 = arith.constant 9.99999993E-9 : f32
    %22 = vector.broadcast %cst_8 : f32 to vector<4x256xf32>
    %23 = arith.addf %21, %22 : vector<4x256xf32>
    %24 = math.log %23 : vector<4x256xf32>
    %25 = arith.mulf %21, %24 : vector<4x256xf32>
    %cst_9 = arith.constant dense<0.000000e+00> : vector<256xf32>
    %26 = vector.multi_reduction <add>, %25, %cst_9 [0] : vector<4x256xf32> to vector<256xf32>
    %27 = vector.shape_cast %26 : vector<256xf32> to vector<1x256xf32>
    %cst_10 = arith.constant 0.000000e+00 : f32
    %28 = vector.broadcast %cst_10 : f32 to vector<1x256xf32>
    %29 = arith.subf %28, %27 : vector<1x256xf32>
    %cst_11 = arith.constant 1.44269502 : f32
    %30 = vector.broadcast %cst_11 : f32 to vector<1x256xf32>
    %31 = arith.mulf %29, %30 : vector<1x256xf32>
    %cst_12 = arith.constant 1.000000e+00 : f32
    %32 = vector.broadcast %cst_12 : f32 to vector<1x256xf32>
    %33 = arith.mulf %31, %32 : vector<1x256xf32>
    %cst_13 = arith.constant 1.000000e+00 : f32
    %34 = vector.broadcast %cst_13 : f32 to vector<1x256xf32>
    %35 = arith.addf %33, %34 : vector<1x256xf32>
    %36 = arith.mulf %21, %8 : vector<4x256xf32>
    %cst_14 = arith.constant dense<0.000000e+00> : vector<256xf32>
    %37 = vector.multi_reduction <add>, %36, %cst_14 [0] : vector<4x256xf32> to vector<256xf32>
    %38 = vector.shape_cast %37 : vector<256xf32> to vector<1x256xf32>
    %39 = arith.mulf %38, %11 : vector<1x256xf32>
    %40 = arith.mulf %35, %39 : vector<1x256xf32>
    %c0_15 = arith.constant 0 : index
    %c0_16 = arith.constant 0 : index
    %c0_17 = arith.constant 0 : index
    %41 = vector.load %arg4[%c0_15, %c0_16, %c0_17] : memref<1x1x256xf32, #tpu.memory_space<vmem>>, vector<1x1x256xf32>
    %42 = vector.shape_cast %41 : vector<1x1x256xf32> to vector<1x256xf32>
    %43 = vector.shape_cast %40 : vector<1x256xf32> to vector<1x1x256xf32>
    tpu.vector_store %arg4[%c0_15, %c0_16, %c0_17], %43 {strides = array<i32>} : memref<1x1x256xf32, #tpu.memory_space<vmem>>, vector<1x1x256xf32>,
    %c0_18 = arith.constant 0 : index
    %c0_19 = arith.constant 0 : index
    %c0_20 = arith.constant 0 : index
    %44 = vector.load %arg5[%c0_18, %c0_19, %c0_20] : memref<1x1x256xf32, #tpu.memory_space<vmem>>, vector<1x1x256xf32>
    %45 = vector.shape_cast %44 : vector<1x1x256xf32> to vector<1x256xf32>
    %46 = vector.shape_cast %35 : vector<1x256xf32> to vector<1x1x256xf32>
    tpu.vector_store %arg5[%c0_18, %c0_19, %c0_20], %46 {strides = array<i32>} : memref<1x1x256xf32, #tpu.memory_space<vmem>>, vector<1x1x256xf32>,
    return
  }
  func.func @transform_0(%arg0: i32, %arg1: i32) -> (i32, i32, i32) {
    %c0_i32 = arith.constant 0 : i32
    %c0_i32_0 = arith.constant 0 : i32
    return %arg0, %c0_i32, %arg1 : i32, i32, i32
  }
  func.func @transform_1(%arg0: i32, %arg1: i32) -> (i32, i32, i32) {
    %c0_i32 = arith.constant 0 : i32
    %c0_i32_0 = arith.constant 0 : i32
    return %arg0, %c0_i32, %arg1 : i32, i32, i32
  }
  func.func @transform_2(%arg0: i32, %arg1: i32) -> (i32, i32, i32) {
    %c0_i32 = arith.constant 0 : i32
    %c0_i32_0 = arith.constant 0 : i32
    return %arg0, %c0_i32, %arg1 : i32, i32, i32
  }
  func.func @transform_3(%arg0: i32, %arg1: i32) -> (i32, i32, i32) {
    %c0_i32 = arith.constant 0 : i32
    %c0_i32_0 = arith.constant 0 : i32
    return %arg0, %c0_i32, %arg1 : i32, i32, i32
  }
}

</mosaic_0001>

<bundles_post_ra>
// kernel: tpu_custom_call.1
= control target key start
LH: loop header
LB: loop body
LE: loop exit
PB: predicated region body
PF: predicated region fallthrough
CT: control target
= control target key end

     0   :  { %9 = vsyncpa [#allocation3], 0  ;;  %s1238_s0 = inlined_call_operand.hbm [shape: f32[2,4,256], index: 0, kind: input, shape index: {}]   ;;  %s1239_s1 = inlined_call_operand.hbm [shape: f32[2,4,256], index: 1, kind: input, shape index: {}]   ;;  %s1240_s2 = inlined_call_operand.hbm [shape: f32[2,1,256], index: 2, kind: output, shape index: {0}]   ;;  %s1241_s3 = inlined_call_operand.hbm [shape: f32[2,1,256], index: 3, kind: output, shape index: {1}]  }
   0x1   :  { %11 = vsyncpa [#allocation3 + $0x1], 0 }
   0x2   :  { %12 = vsyncpa [#allocation6], 0 }
   0x3   :  { %14 = vsyncpa [#allocation6 + $0x1], 0 }
   0x4   :  { %15 = vsyncpa [#allocation4], 0 }
   0x5   :  { %17 = vsyncpa [#allocation4 + $0x1], 0 }
   0x6   :  { %18 = vsyncpa [#allocation9], 0 }
   0x7   :  { %20 = vsyncpa [#allocation9 + $0x1], 0  ;;  %s993_s12 = smov 0   ;;  %s995_s13 = smov 0  }
   0x8   :  { %s997_s14 = smov 0   ;;  %s999_s15 = smov 0  }
   0x9   :  { %s1001_s16 = smov 0   ;;  %s1003_s17 = smov 0  }
   0xa LB: > { %s684_s18 = sadd.s32 4294967295, %s971_s17   ;;  %s685_s19 = sadd.s32 4294967294, %s971_s17   ;;  %s971_s17 = sphi %s1003_s17, %s26_s17   ;;  %s967_s16 = sphi %s1001_s16, %s1260_s16   ;;  %s963_s15 = sphi %s999_s15, %s1259_s15   ;;  %s959_s14 = sphi %s997_s14, %s1258_s14   ;;  %s955_s13 = sphi %s995_s13, %s1257_s13   ;;  %s951_s12 = sphi %s993_s12, %s1256_s12  }
   0xb   : > { %s38_s20 = sadd.s32 1, %s967_s16  ;;  %s47_s21 = sadd.s32 1, %s959_s14 }
   0xc   : > { %p40_p0 = scmp.ge.s32.totalorder %s38_s20, 2  ;;  %p54_p1 = scmp.ne.s32.totalorder %s959_s14, %s955_s13 }
   0xd   : > { %p55_p2 = scmp.eq.s32.totalorder %s971_s17, 0  ;;  %p60_p3 = scmp.ne.s32.totalorder %s955_s13, %s951_s12 }
   0xe   : > { %s1262_s20 = smov (%p40_p0, %s38_s20), 0  ;;  %p61_p5 = scmp.eq.s32.totalorder %s684_s18, 0 }
   0xf   : > { %p1034_p4 = por %p55_p2, %p54_p1  ;;  %s42_s23 = ssub.s32 %s967_s16, %s1262_s20 }
  0x10   : > { %p114_p6 = scmp.eq.s32.totalorder %s684_s18, 1  ;;  %p45_p7 = scmp.eq.s32.totalorder %s42_s23, 0 }
  0x11   : > { %p1040_p8 = por %p61_p5, %p60_p3  ;;  %p120_p10 = scmp.eq.s32.totalorder %s685_s19, 1 }
  0x12   : > { %p1044_p9 = por %p114_p6, %p54_p1  ;;  %p687_p12 = scmp.ge.s32.totalorder %s971_s17, 2 }
  0x13   : > { %s1049_s26 = scalar_select %p45_p7, %s959_s14, %s47_s21  }
  0x14   : > { %p1051_p11 = por %p120_p10, %p60_p3  ;;  %p729_p13 = scmp.lt.s32.totalorder %s971_s17, 2 }
  0x15   : > { %s168_s28 = sand.u32 1, %s959_s14   ;;  %s705_s30 = sshll.u32 %s967_s16, 3 }
  0x16   : > { %s688_s29 = sshll.u32 %s168_s28, 3  ;;  %s179_s6 = scalar_lea.hbm %s1238_s0, %s705_s30 }
  0x17   : > { %s172_s7 = scalar_lea.vmem [#allocation2], %s688_s29  ;;  %s181_s9 = sshll.u32 %s179_s6, 4  ;;  %s182_s9 = int_to_ptr.hbm [resolvable:$true] %s181_s9 }
  0x18   : > { %s183_s8 = sshll.u32 %s172_s7, 4  ;;  %p716_p0 = pnand %p729_p13, %p1034_p4  ;;  %s184_s8 = int_to_ptr.vmem [resolvable:$true] %s183_s8 }
  0x19   : > { %p694_p1 = scmp.ge.s32.totalorder %s971_s17, 1  ;;  %p210_p2 = scmp.lt.s32.totalorder %s971_s17, 3 }
  0x1a   : > { %s169_s10 = scalar_lea.sflag [#allocation3], %s168_s28  ;;  %s201_s19 = scalar_lea.hbm %s1239_s1, %s705_s30 }
  0x1b   : > { %718 = dma.hbm_to_vmem [thread:$0]  (!%p716_p0), %s182_s9, 128, %s184_s8, %s169_s10  }
  0x1c   : > { %p211_p3 = pnand %p694_p1, %p210_p2  ;;  %s194_s21 = scalar_lea.vmem [#allocation5], %s688_s29 }
  0x1d   : > { %s205_s23 = sshll.u32 %s194_s21, 4  ;;  %s203_s4 = sshll.u32 %s201_s19, 4  ;;  %s206_s23 = int_to_ptr.vmem [resolvable:$true] %s205_s23  ;;  %s204_s4 = int_to_ptr.hbm [resolvable:$true] %s203_s4 }
  0x1e   : > { %s191_s5 = scalar_lea.sflag [#allocation6], %s168_s28  ;;  %214 = sbr.rel (%p211_p3) target bundleno = 220 (0xdc), region = 28 }
  0x1f   : > { %721 = dma.hbm_to_vmem [thread:$0]  (!%p716_p0), %s204_s4, 128, %s206_s23, %s191_s5  }
  0x20   : > { %s1070_s22 = sand.u32 (!%p211_p3), 1, %s955_s13  }
  0x21   : > { %s695_s6 = sshll.u32 (!%p211_p3), %s1070_s22, 3  ;;  %s217_s7 = scalar_lea.sflag (!%p211_p3), [#allocation3], %s1070_s22 }
  0x22   : > { %s220_s8 = scalar_lea.vmem (!%p211_p3), [#allocation2], %s695_s6 }
  0x23   : > { %934 = dma.done.wait (%p1040_p8), %s217_s7, 128  }
  0x24   : > { %936 = vsyncadd (%p1040_p8), %s217_s7, 4294967168  ;;  %s227_s29 = scalar_lea.sflag [#allocation6], %s1070_s22  ;;  %s230_s28 = scalar_lea.vmem [#allocation5], %s695_s6 }
  0x25   : > { %938 = dma.done.wait (%p1040_p8), %s227_s29, 128  }
  0x26   : > { %940 = vsyncadd (%p1040_p8), %s227_s29, 4294967168  ;;  %v268_v0 = vld [vmem:[%s220_s8] sm:$0xff]  ;;  %vm276_vm0 = vcmask 1043456   ;;  %v269_v22 = vld [vmem:[%s230_s28] sm:$0xff]  ;;  %s701_s24 = sshll.u32 %s963_s15, 1  ;;  %s697_s30 = sshll.u32 %s1070_s22, 1 }
  0x27   : > { %271 = vst [vmem:[#allocation1] ss:$2 sm:$0xff] %v268_v0  ;;  %s1141_s11 = scalar_lea.hbm %s1241_s3, %s701_s24  ;;  %s263_s18 = scalar_lea.vmem [#allocation8], %s697_s30 }
  0x28   : > { %s537_s19 = sshll.u32 %s263_s18, 4  ;;  %s539_s21 = sshll.u32 %s1141_s11, 4  ;;  %s1172_s19 = int_to_ptr.vmem [resolvable:$true] %s537_s19  ;;  %s540_s21 = int_to_ptr.hbm [resolvable:$true] %s539_s21 }
  0x29   : > { %s1179_s5 = scalar_lea.hbm %s1240_s2, %s701_s24  ;;  %s256_s15 = scalar_lea.vmem [#allocation7], %s697_s30 }
  0x2a   : > { %s521_s6 = sshll.u32 %s256_s15, 4  ;;  %s523_s7 = sshll.u32 %s1179_s5, 4  ;;  %s522_s6 = int_to_ptr.vmem [resolvable:$true] %s521_s6  ;;  %s524_s7 = int_to_ptr.hbm [resolvable:$true] %s523_s7 }
  0x2b   : > { %s507_s8 = scalar_lea.sflag [#allocation9], %s1070_s22  ;;  %s867_s29 = sshra.s32 %s540_s21, 4  ;;  %s868_s29 = int_to_ptr.hbm [resolvable:$true] %s867_s29 }
  0x2c   : > { %s869_s28 = scalar_lea.hbm %s868_s29, 2  ;;  %s873_s10 = scalar_lea.hbm %s1241_s3, 4 }
  0x2d   : > { %p870_p4 = scmp.ne.s32.totalorder %s868_s29, %s869_s28  ;;  %p874_p7 = scmp.lt.s32.totalorder %s868_s29, %s1241_s3 }
  0x2e   : > { %v272_v1 = vld.sshfl [vmem:[#allocation1] sm:$0xff pattern:$0x75316420]  ;;  %v273_v2 = vld.sshfl [vmem:[#allocation1 + $0x8] sm:$0xff pattern:$0x75316420]  ;;  %p875_p8 = scmp.lt.s32.totalorder %s873_s10, %s869_s28 }
  0x2f   : > { %v277_v3 = vsel %vm276_vm0, %v272_v1, -inf  ;;  %v284_v4 = vsel %vm276_vm0, %v273_v2, -inf  ;;  %p871_p5 = pnand %p870_p4, %p1044_p9 }
  0x30   : > { %v278_v5 = vrot.slane %v277_v3, 4  ;;  %v285_v6 = vrot.slane %v284_v4, 4  ;;  %p876_p10 = por %p875_p8, %p874_p7 }
  0x31   : > { %p872_p6 = pneg %p871_p5 }
  0x32   : > { %v279_v7 = vmax.f32 %v277_v3, %v278_v5  ;;  %v286_v8 = vmax.f32 %v284_v4, %v285_v6 }
  0x33   : > { %p877_p13 = pnand %p876_p10, %p872_p6 }
  0x34   : > { %v280_v9 = vrot.slane %v279_v7, 2  ;;  %v287_v10 = vrot.slane %v286_v8, 2 }
  0x36   : > { %v281_v11 = vmax.f32 %v279_v7, %v280_v9  ;;  %v288_v12 = vmax.f32 %v286_v8, %v287_v10 }
  0x38   : > { %v282_v13 = vrot.slane %v281_v11, 1  ;;  %v289_v14 = vrot.slane %v288_v12, 1 }
  0x3a   : > { %v290_v15 = vmax.f32 %v288_v12, %v289_v14  ;;  %v283_v16 = vmax.f32 %v281_v11, %v282_v13 }
  0x3c   : > { %v293_v17 = vrot.slane %v290_v15, 4 }
  0x3e   : > { %v294_v18 = vsel %vm276_vm0, %v283_v16, %v293_v17 }
  0x3f   : > { %v296_v19 = vsub.f32 %v268_v0, %v294_v18 }
  0x41   : > { %v297_v20 = vmul.f32 1.442695, %v296_v19 }
  0x43   : > { %779 = vpow2.f32 %v297_v20 }
  0x49   : > { %v1086_v21 = vpop.eup %779 }
  0x4a   : > { %300 = vst [vmem:[#allocation1] ss:$2 sm:$0xff] %v1086_v21 }
  0x51   : > { %v301_v23 = vld.sshfl [vmem:[#allocation1] sm:$0xff pattern:$0x75316420]  ;;  %v302_v24 = vld.sshfl [vmem:[#allocation1 + $0x8] sm:$0xff pattern:$0x75316420] }
  0x52   : > { %348 = vst [vmem:[#allocation1] ss:$2 sm:$0xff] %v269_v22  ;;  %v305_v0 = vsel %vm276_vm0, %v301_v23, 0.0  ;;  %v312_v2 = vsel %vm276_vm0, %v302_v24, 0.0 }
  0x53   : > { %v306_v5 = vrot.slane %v305_v0, 4  ;;  %v313_v7 = vrot.slane %v312_v2, 4 }
  0x55   : > { %v307_v14 = vadd.f32 %v306_v5, %v305_v0  ;;  %v314_v18 = vadd.f32 %v313_v7, %v312_v2 }
  0x59   : > { %v349_v25 = vld.sshfl [vmem:[#allocation1] sm:$0xff pattern:$0x75316420]  ;;  %v350_v26 = vld.sshfl [vmem:[#allocation1 + $0x8] sm:$0xff pattern:$0x75316420] }
  0x5a   : > { %v353_v27 = vsel %vm276_vm0, %v349_v25, -inf  ;;  %v360_v28 = vsel %vm276_vm0, %v350_v26, -inf  ;;  %v308_v25 = vrot.slane %v307_v14, 2 }
  0x5b   : > { %v354_v29 = vrot.slane %v353_v27, 4  ;;  %v361_v30 = vrot.slane %v360_v28, 4 }
  0x5d   : > { %v355_v31 = vmax.f32 %v353_v27, %v354_v29  ;;  %v362_v32 = vmax.f32 %v360_v28, %v361_v30  ;;  %v315_v27 = vrot.slane %v314_v18, 2 }
  0x5f   : > { %v356_v33 = vrot.slane %v355_v31, 2  ;;  %v363_v34 = vrot.slane %v362_v32, 2 }
  0x61   : > { %v357_v35 = vmax.f32 %v355_v31, %v356_v33  ;;  %v364_v36 = vmax.f32 %v362_v32, %v363_v34  ;;  %v309_v31 = vadd.f32 %v308_v25, %v307_v14  ;;  %v316_v32 = vadd.f32 %v315_v27, %v314_v18 }
  0x63   : > { %v358_v37 = vrot.slane %v357_v35, 1  ;;  %v365_v38 = vrot.slane %v364_v36, 1  ;;  %v310_v34 = vrot.slane %v309_v31, 1 }
  0x65   : > { %v366_v39 = vmax.f32 %v364_v36, %v365_v38  ;;  %v359_v40 = vmax.f32 %v357_v35, %v358_v37  ;;  %v317_v35 = vrot.slane %v316_v32, 1  ;;  %v1103_v36 = vadd.f32 %v310_v34, %v309_v31 }
  0x67   : > { %v369_v41 = vrot.slane %v366_v39, 4  ;;  %v1105_v38 = vadd.f32 %v317_v35, %v316_v32  ;;  %vm324_vm9 = vweird.f32 %v1103_v36  ;;  %v328_v5 = vand.u32 2147483647, %v1103_v36 }
  0x69   : > { %v370_v42 = vsel %vm276_vm0, %v359_v40, %v369_v41  ;;  %vm338_vm12 = vweird.f32 %v1105_v38  ;;  %v342_v18 = vand.u32 2147483647, %v1105_v38  ;;  %vm1154_vm14 = vcmp.eq.f32.partialorder %v328_v5, 8.507059e+37 }
  0x6a   : > { %v372_v43 = vsub.f32 %v269_v22, %v370_v42 }
  0x6c   : > { %v373_v44 = vmul.f32 1.442695, %v372_v43 }
  0x6e   : > { %781 = vpow2.f32 %v373_v44 }
  0x74   : > { %v782_v45 = vpop.eup %781 }
  0x75   : > { %376 = vst [vmem:[#allocation1] ss:$2 sm:$0xff] %v782_v45 }
  0x7c   : > { %v377_v46 = vld.sshfl [vmem:[#allocation1] sm:$0xff pattern:$0x75316420]  ;;  %v378_v47 = vld.sshfl [vmem:[#allocation1 + $0x8] sm:$0xff pattern:$0x75316420] }
  0x7d   : > { %v381_v48 = vsel %vm276_vm0, %v377_v46, 0.0  ;;  %v388_v49 = vsel %vm276_vm0, %v378_v47, 0.0 }
  0x7e   : > { %v382_v50 = vrot.slane %v381_v48, 4  ;;  %v389_v51 = vrot.slane %v388_v49, 4 }
  0x80   : > { %v383_v52 = vadd.f32 %v382_v50, %v381_v48  ;;  %v390_v53 = vadd.f32 %v389_v51, %v388_v49 }
  0x82   : > { %v384_v54 = vrot.slane %v383_v52, 2  ;;  %v391_v55 = vrot.slane %v390_v53, 2 }
  0x84   : > { %v385_v56 = vadd.f32 %v384_v54, %v383_v52  ;;  %v392_v57 = vadd.f32 %v391_v55, %v390_v53 }
  0x86   : > { %v386_v58 = vrot.slane %v385_v56, 1  ;;  %v393_v59 = vrot.slane %v392_v57, 1 }
  0x88   : > { %v387_v60 = vadd.f32 %v386_v58, %v385_v56  ;;  %v394_v61 = vadd.f32 %v393_v59, %v392_v57 }
  0x8a   : > { %783 = vrcp.f32 %v387_v60  ;;  %v420_v9 = vand.u32 2147483648, %v394_v61  ;;  %v418_v11 = vand.u32 2147483647, %v394_v61  ;;  %vm400_vm3 = vweird.f32 %v387_v60 }
  0x8b   : > { %785 = vrcp.f32 %v394_v61  ;;  %v406_v13 = vand.u32 2147483648, %v387_v60  ;;  %v404_v16 = vand.u32 2147483647, %v387_v60  ;;  %vm414_vm5 = vweird.f32 %v394_v61 }
  0x8c   : > { %v421_v19 = vor.u32 1.1754944e-38, %v420_v9  ;;  %vm419_vm7 = vcmp.eq.f32.partialorder %v418_v11, 8.507059e+37 }
  0x8d   : > { %v407_v23 = vor.u32 1.1754944e-38, %v406_v13  ;;  %vm405_vm8 = vcmp.eq.f32.partialorder %v404_v16, 8.507059e+37 }
  0x90   : > { %v784_v62 = vpop.eup %783 }
  0x91   : > { %v786_v63 = vpop.eup %785  ;;  %v396_v1 = vmul.f32 %v784_v62, %v387_v60  ;;  %vm401_vm1 = vweird.f32 %v784_v62 }
  0x92   : > { %v410_v3 = vmul.f32 %v786_v63, %v394_v61  ;;  %vm415_vm2 = vweird.f32 %v786_v63  ;;  %vm1096_vm4 = vmor %vm400_vm3, %vm401_vm1 }
  0x93   : > { %v397_v4 = vsub.f32 1.0, %v396_v1  ;;  %vm416_vm6 = vmor %vm414_vm5, %vm415_vm2  ;;  %vm343_vm2 = vcmp.eq.f32.partialorder %v342_v18, 8.507059e+37 }
  0x94   : > { %v411_v6 = vsub.f32 1.0, %v410_v3 }
  0x95   : > { %v398_v8 = vmul.f32 %v784_v62, %v397_v4 }
  0x96   : > { %v412_v10 = vmul.f32 %v786_v63, %v411_v6  ;;  %v330_v6 = vand.u32 2147483648, %v1103_v36 }
  0x97   : > { %v399_v12 = vadd.f32 %v784_v62, %v398_v8 }
  0x98   : > { %v413_v17 = vadd.f32 %v786_v63, %v412_v10 }
  0x99   : > { %v403_v20 = vsel %vm1096_vm4, %v784_v62, %v399_v12 }
  0x9a   : > { %v417_v22 = vsel %vm416_vm6, %v786_v63, %v413_v17  ;;  %v408_v28 = vsel %vm405_vm8, %v407_v23, %v403_v20  ;;  %v490_v17 = vlaneseq }
  0x9b   : > { %v422_v24 = vsel %vm419_vm7, %v421_v19, %v417_v22  ;;  %v344_v19 = vand.u32 2147483648, %v1105_v38 }
  0x9c   : > { %v425_v26 = vrot.slane %v422_v24, 4  ;;  %vm1168_vm1 = vcmp.lt.s32.totalorder %v490_v17, 256 }
  0x9d   : > { %v345_v35 = vor.u32 1.1754944e-38, %v344_v19 }
  0x9e   : > { %v426_v29 = vsel %vm276_vm0, %v408_v28, %v425_v26  ;;  %v331_v28 = vor.u32 1.1754944e-38, %v330_v6 }
  0x9f   : > { %v428_v30 = vmul.f32 %v782_v45, %v426_v29 }
  0xa1   : > { %v429_v33 = vadd.f32 1e-08, %v428_v30  ;;  %v459_v43 = vmul.f32 %v1086_v21, %v428_v30 }
  0xa3   : > { %787 = vlog2.f32 %v429_v33 }
  0xa4   : > { %789 = vrcp.f32 %v1103_v36 }
  0xa5   : > { %791 = vrcp.f32 %v1105_v38 }
  0xa9   : > { %v788_v37 = vpop.eup %787 }
  0xaa   : > { %v431_v39 = vmul.f32 0.6931472, %v788_v37  ;;  %v1109_v41 = vpop.eup %789 }
  0xab   : > { %v1111_v42 = vpop.eup %791  ;;  %v320_v48 = vmul.f32 %v1109_v41, %v1103_v36  ;;  %vm325_vm10 = vweird.f32 %v1109_v41 }
  0xac   : > { %v432_v40 = vmul.f32 %v431_v39, %v428_v30  ;;  %v334_v49 = vmul.f32 %v1111_v42, %v1105_v38  ;;  %vm339_vm11 = vweird.f32 %v1111_v42  ;;  %vm1145_vm13 = vmor %vm324_vm9, %vm325_vm10 }
  0xad   : > { %v321_v54 = vsub.f32 1.0, %v320_v48  ;;  %vm1160_vm15 = vmor %vm338_vm12, %vm339_vm11 }
  0xae   : > { %434 = vst [vmem:[#allocation1] ss:$2 sm:$0xff] %v432_v40  ;;  %v335_v55 = vsub.f32 1.0, %v334_v49 }
  0xaf   : > { %v322_v61 = vmul.f32 %v1109_v41, %v321_v54 }
  0xb0   : > { %v336_v62 = vmul.f32 %v1111_v42, %v335_v55 }
  0xb1   : > { %v323_v11 = vadd.f32 %v1109_v41, %v322_v61 }
  0xb2   : > { %v337_v12 = vadd.f32 %v1111_v42, %v336_v62 }
  0xb3   : > { %v327_v26 = vsel %vm1145_vm13, %v1109_v41, %v323_v11 }
  0xb4   : > { %v341_v31 = vsel %vm1160_vm15, %v1111_v42, %v337_v12  ;;  %v332_v40 = vsel %vm1154_vm14, %v331_v28, %v327_v26 }
  0xb5   : > { %v435_v44 = vld.sshfl [vmem:[#allocation1] sm:$0xff pattern:$0x75316420]  ;;  %v436_v45 = vld.sshfl [vmem:[#allocation1 + $0x8] sm:$0xff pattern:$0x75316420]  ;;  %v346_v41 = vsel %vm343_vm2, %v345_v35, %v341_v31 }
  0xb6   : > { %461 = vst [vmem:[#allocation1] ss:$2 sm:$0xff] %v459_v43  ;;  %v439_v46 = vsel %vm276_vm0, %v435_v44, 0.0  ;;  %v446_v47 = vsel %vm276_vm0, %v436_v45, 0.0 }
  0xb7   : > { %v440_v50 = vrot.slane %v439_v46, 4  ;;  %v447_v51 = vrot.slane %v446_v47, 4 }
  0xb9   : > { %v441_v52 = vadd.f32 %v440_v50, %v439_v46  ;;  %v448_v53 = vadd.f32 %v447_v51, %v446_v47 }
  0xbb   : > { %v442_v21 = vrot.slane %v441_v52, 2  ;;  %v449_v56 = vrot.slane %v448_v53, 2 }
  0xbd   : > { %v443_v57 = vadd.f32 %v442_v21, %v441_v52  ;;  %v450_v58 = vadd.f32 %v449_v56, %v448_v53  ;;  %v462_v59 = vld.sshfl [vmem:[#allocation1] sm:$0xff pattern:$0x75316420]  ;;  %v463_v60 = vld.sshfl [vmem:[#allocation1 + $0x8] sm:$0xff pattern:$0x75316420] }
  0xbe   : > { %v466_v63 = vsel %vm276_vm0, %v462_v59, 0.0  ;;  %v473_v0 = vsel %vm276_vm0, %v463_v60, 0.0  ;;  %vm487_vm0 = vcmask 1040384  }
  0xbf   : > { %v444_v1 = vrot.slane %v443_v57, 1  ;;  %v451_v2 = vrot.slane %v450_v58, 1  ;;  %v467_v3 = vrot.slane %v466_v63, 4  ;;  %v474_v4 = vrot.slane %v473_v0, 4 }
  0xc1   : > { %v445_v7 = vadd.f32 %v444_v1, %v443_v57  ;;  %v452_v8 = vadd.f32 %v451_v2, %v450_v58  ;;  %v468_v9 = vadd.f32 %v467_v3, %v466_v63  ;;  %v475_v10 = vadd.f32 %v474_v4, %v473_v0 }
  0xc3   : > { %v453_v13 = vsub.f32 0.0, %v445_v7  ;;  %v454_v14 = vsub.f32 0.0, %v452_v8  ;;  %v469_v15 = vrot.slane %v468_v9, 2  ;;  %v476_v16 = vrot.slane %v475_v10, 2 }
  0xc5   : > { %v455_v20 = vmul.f32 1.442695, %v453_v13  ;;  %v456_v22 = vmul.f32 1.442695, %v454_v14  ;;  %v470_v24 = vadd.f32 %v469_v15, %v468_v9  ;;  %v477_v25 = vadd.f32 %v476_v16, %v475_v10 }
  0xc7   : > { %v458_v30 = vadd.f32 1.0, %v456_v22  ;;  %v471_v32 = vrot.slane %v470_v24, 1  ;;  %v478_v33 = vrot.slane %v477_v25, 1  ;;  %v457_v36 = vadd.f32 1.0, %v455_v20 }
  0xc9   : > { %v497_v37 = vrot.slane %v458_v30, 7  ;;  %v472_v38 = vadd.f32 %v471_v32, %v470_v24  ;;  %v479_v39 = vadd.f32 %v478_v33, %v477_v25 }
  0xcb   : > { %v498_v42 = vsel %vm487_vm0, %v457_v36, %v497_v37  ;;  %v480_v43 = vmul.f32 %v472_v38, %v332_v40  ;;  %v481_v44 = vmul.f32 %v479_v39, %v346_v41 }
  0xcc   : > { %500 = vst.msk [vmem:[%s263_s18] sm:$0x3] %vm1168_vm1, %v498_v42 }
  0xcd   : > { %v483_v45 = vmul.f32 %v481_v44, %v458_v30 }
  0xce   : > { %880 = shalt.err (!%p877_p13)
}
  0xcf   : > { %712 = dma.vmem_to_hbm [thread:$0]  (%p1044_p9), %s1172_s19, 32, %s540_s21, %s507_s8   ;;  %v482_v46 = vmul.f32 %v480_v43, %v457_v36  ;;  %v486_v47 = vrot.slane %v483_v45, 7 }
  0xd0   : > { %s502_s30 = scalar_lea.sflag [#allocation4], %s1070_s22  ;;  %s895_s18 = sshra.s32 %s524_s7, 4  ;;  %s896_s18 = int_to_ptr.hbm [resolvable:$true] %s895_s18 }
  0xd1   : > { %v488_v48 = vsel %vm487_vm0, %v482_v46, %v486_v47  ;;  %s897_s4 = scalar_lea.hbm %s896_s18, 2  ;;  %s901_s19 = scalar_lea.hbm %s1240_s2, 4 }
  0xd2   : > { %494 = vst.msk [vmem:[%s256_s15] sm:$0x3] %vm1168_vm1, %v488_v48  ;;  %p898_p0 = scmp.ne.s32.totalorder %s896_s18, %s897_s4  ;;  %p902_p3 = scmp.lt.s32.totalorder %s896_s18, %s1240_s2 }
  0xd3   : > { %p903_p4 = scmp.lt.s32.totalorder %s901_s19, %s897_s4 }
  0xd4   : > { %p899_p1 = pnand %p898_p0, %p1044_p9 }
  0xd5   : > { %p904_p5 = por %p903_p4, %p902_p3 }
  0xd6   : > { %p900_p2 = pneg %p899_p1 }
  0xd8   : > { %p905_p6 = pnand %p904_p5, %p900_p2 }
  0xda   : > { %908 = shalt.err (!%p905_p6)
}
  0xdb   : > { %711 = dma.vmem_to_hbm [thread:$0]  (%p1044_p9), %s522_s6, 32, %s524_s7, %s502_s30  }
  0xdc PF: > { %s551_s22 = sand.u32 1, %s951_s12   ;;  %p723_p7 = pnand %p687_p12, %p1051_p11 }
  0xdd   : > { %s552_s15 = scalar_lea.sflag [#allocation4], %s551_s22 }
  0xde   : > { %p724_p8 = pneg %p723_p7 }
  0xe0   : > { %942 = dma.done.wait (%p724_p8), %s552_s15, 32  }
  0xe1   : > { %944 = vsyncadd (%p724_p8), %s552_s15, 4294967264  ;;  %s562_s28 = scalar_lea.sflag [#allocation9], %s551_s22 }
  0xe2   : > { %946 = dma.done.wait (%p724_p8), %s562_s28, 32  }
  0xe3   : > { %948 = vsyncadd (%p724_p8), %s562_s28, 4294967264  ;;  %s26_s17 = sadd.s32 1, %s971_s17   ;;  %s1256_s12 = smov %s955_s13 }
  0xe4   : > { %p23_p10 = scmp.ge.s32.totalorder %s26_s17, 4   ;;  %s1257_s13 = smov %s959_s14 }
  0xe5   : > { %s1258_s14 = smov %s1049_s26  ;;  %s1259_s15 = smov %s967_s16 }
  0xe6   : > { %s1260_s16 = smov %s1262_s20  ;;  %25 = sbr.rel (!%p23_p10) target bundleno = 10 (0xa), region = 103 }
  0xeb   :  { %568 = vsyncpa [#allocation3], 1 }
  0xec   :  { %570 = vsyncpa [#allocation3 + $0x1], 1 }
  0xed   :  { %571 = vsyncpa [#allocation6], 1 }
  0xee   :  { %573 = vsyncpa [#allocation6 + $0x1], 1 }
  0xef   :  { %574 = vsyncpa [#allocation4], 1 }
  0xf0   :  { %576 = vsyncpa [#allocation4 + $0x1], 1 }
  0xf1   :  { %577 = vsyncpa [#allocation9], 1 }
  0xf2   :  { %579 = vsyncpa [#allocation9 + $0x1], 1 }

</bundles_post_ra>
